<compile_context>
chip_gen: v7x
topology: tpu7x:2x2x1
jax: 0.10.0
libtpu: 0.0.40
codegen_flags: <defaults>
</compile_context>

<pallas_src>
import functools

import jax
import jax.numpy as jnp
from jax import lax
from jax.experimental import pallas as pl
from jax.experimental.pallas import tpu as pltpu

ALPHA = 2.0
EPSILON = 0.01

LANES = 128
SUBLANES = 8


def _round_up(x, m):
    return ((x + m - 1) // m) * m


def _device_config():
    """Returns (num_slices, max_tile_rows) for the local TPU generation.

    num_slices = TensorCores per chip sharded via the leading "parallel" grid axis.
    max_tile_rows keeps 2 inputs x 2 double-buffers of (tile, 128) f32 under the
    scoped-VMEM default (v7x: 8192 rows -> 16 MiB of 32 MiB; v5e/v6e: 4096 -> 8 MiB).
    """
    try:
        kind = jax.devices()[0].device_kind.lower()
    except Exception:  # pragma: no cover - no device info -> conservative defaults
        kind = ""
    if "v7" in kind or "tpu7" in kind:
        return 2, 8192
    return 1, 4096


def _psmse_kernel(pred_ref, targ_ref, acc_ref, *, alpha, epsilon, total_rows):
    """One (tile_m, 128) block of the elementwise loss, accumulated per lane.

    acc_ref is the (1, 8, 128) per-slice output block, resident across the trailing
    (reduction) grid axis; it is zeroed on the first reduction step.
    """
    i = pl.program_id(1)

    @pl.when(i == 0)
    def _():
        acc_ref[...] = jnp.zeros_like(acc_ref)

    tile_m = pred_ref.shape[0]
    block_idx = pl.program_id(0) * pl.num_programs(1) + i
    valid_rows = total_rows - block_idx * tile_m  # may be <= 0 or >= tile_m

    p = pred_ref[...].astype(jnp.float32)
    t = targ_ref[...].astype(jnp.float32)

    diff = p - t
    sq = diff * diff
    # Single reciprocal on the EUP instead of two VALU divisions.
    inv_denom = pl.reciprocal(jnp.abs(t) + jnp.float32(epsilon), approx=False)
    same_sign = (t * p) > 0.0  # strict '>' to match the PyTorch reference
    # alpha*sq - (alpha-1)*t^2 == sq + (alpha-1)*(sq - t^2): saves ~2 VALU ops/elem.
    num = sq + jnp.where(same_sign, jnp.float32(0.0),
                         jnp.float32(alpha - 1.0) * (sq - t * t))
    loss = num * inv_denom

    def lane_partials(x):
        # (tile_m, 128) -> (tile_m/8, 8, 128) matches the vreg tiling: pure VPU adds,
        # no cross-lane XLU reduce in the hot loop.
        return jnp.sum(x.reshape(tile_m // SUBLANES, SUBLANES, LANES), axis=0)[None]

    # Hot path: fully valid block, no masking ops at all.
    @pl.when(valid_rows >= tile_m)
    def _():
        acc_ref[...] += lane_partials(loss)

    # Cold path: ragged (or clamped-empty) tail block. Mask the loss -- not p/t -- so
    # any garbage (possibly Inf/NaN) in out-of-bounds rows becomes 0 before accumulate.
    @pl.when(valid_rows < tile_m)
    def _():
        row_ids = lax.broadcasted_iota(jnp.int32, loss.shape, 0)
        masked = jnp.where(row_ids < valid_rows, loss, jnp.float32(0.0))
        acc_ref[...] += lane_partials(masked)


def proportional_signed_mse(predictions, targets, *, alpha=ALPHA, epsilon=EPSILON):
    """Pallas equivalent of ProportionalSignedlMSE.forward -> scalar mean loss."""
    assert predictions.shape == targets.shape
    n_total = predictions.size
    assert n_total > 0

    num_slices, max_tile_m = _device_config()

    pred_flat = predictions.reshape(-1)  # reshape of contiguous data: free
    targ_flat = targets.reshape(-1)

    # Sub-32-bit dtypes pack along sublanes: round the tile to the packed tile height.
    itemsize = max(pred_flat.dtype.itemsize, targ_flat.dtype.itemsize)
    sub_mult = max(SUBLANES, 32 // max(int(itemsize), 1))  # 8 f32, 16 bf16, 32 int8/fp8

    rows = pl.cdiv(n_total, LANES)
    if rows < 2 * num_slices * sub_mult:
        num_slices = 1  # tiny input: splitting across cores is pure overhead

    # Pick the block count first (multiple of num_slices), then derive the tile height:
    # row overshoot is bounded by < nblocks * sub_mult instead of num_slices * tile_m.
    nblocks = _round_up(pl.cdiv(rows, max_tile_m), num_slices)
    tile_m = _round_up(pl.cdiv(rows, nblocks), sub_mult)
    blocks_per_slice = nblocks // num_slices
    grid = (num_slices, blocks_per_slice)

    # arr_rows > rows only for tiny single-block inputs (guarantees the block fits).
    arr_rows = max(rows, tile_m)
    pad_elems = arr_rows * LANES - n_total
    if pad_elems:
        # Zero pad elements contribute exactly zero loss (diff=0, t=0 -> both branches 0).
        # Lane-aligned inputs (the common case) skip this entirely -> zero extra HBM copies.
        pred_flat = jnp.pad(pred_flat, (0, pad_elems))
        targ_flat = jnp.pad(targ_flat, (0, pad_elems))

    pred2d = pred_flat.reshape(arr_rows, LANES)
    targ2d = targ_flat.reshape(arr_rows, LANES)

    # Clamp the block index so no block origin is ever out of bounds; clamped duplicate
    # blocks are fully masked in-kernel (valid_rows <= 0) and contribute nothing.
    last_block = pl.cdiv(arr_rows, tile_m) - 1

    def in_map(c, i):
        return (jnp.minimum(c * blocks_per_slice + i, last_block), 0)

    kernel = functools.partial(
        _psmse_kernel,
        alpha=float(alpha),
        epsilon=float(epsilon),
        total_rows=arr_rows,
    )

    n_eff = arr_rows * LANES
    in_bytes = n_eff * (pred2d.dtype.itemsize + targ2d.dtype.itemsize)
    cost = pl.CostEstimate(
        flops=10 * n_eff,
        transcendentals=n_eff,
        bytes_accessed=in_bytes + num_slices * SUBLANES * LANES * 4,
    )

    partials = pl.pallas_call(
        kernel,
        out_shape=jax.ShapeDtypeStruct((num_slices, SUBLANES, LANES), jnp.float32),
        grid_spec=pltpu.PrefetchScalarGridSpec(
            num_scalar_prefetch=0,
            grid=grid,
            in_specs=[
                pl.BlockSpec((tile_m, LANES), in_map),
                pl.BlockSpec((tile_m, LANES), in_map),
            ],
            out_specs=pl.BlockSpec((1, SUBLANES, LANES), lambda c, i: (c, 0, 0)),
        ),
        compiler_params=pltpu.CompilerParams(
            dimension_semantics=("parallel", "arbitrary"),
        ),
        cost_estimate=cost,
    )(pred2d, targ2d)

    # Single tiny cross-lane reduce + mean (divide by the TRUE element count).
    return (jnp.sum(partials) / jnp.float32(n_total)).astype(jnp.float32)


def _reference(predictions, targets, alpha=ALPHA, epsilon=EPSILON):
    diff = predictions - targets
    denom = jnp.abs(targets) + epsilon
    loss = jnp.where(
        targets * predictions > 0,
        diff * diff / denom,
        alpha * (diff * diff) / denom - (alpha - 1.0) * targets * targets / denom,
    )
    return jnp.mean(loss)


if __name__ == "__main__":
    key = jax.random.PRNGKey(0)
    k1, k2 = jax.random.split(key)

    # Small shapes: batch=2, channels=4, spatial=16x16 (2048 elements, lane-aligned ->
    # zero-copy streaming path).
    shape = (2, 4, 16, 16)
    predictions = jax.random.normal(k1, shape, dtype=jnp.float32)
    targets = jax.random.normal(k2, shape, dtype=jnp.float32)

    out = jax.block_until_ready(proportional_signed_mse(predictions, targets))
    ref = _reference(predictions, targets)
    assert jnp.allclose(out, ref, rtol=1e-4, atol=1e-5), (out, ref)

    # Non-lane-aligned element count (210) exercises the tiny-tail pad path.
    shape2 = (2, 3, 7, 5)
    p2 = jax.random.normal(k1, shape2, dtype=jnp.float32)
    t2 = jax.random.normal(k2, shape2, dtype=jnp.float32)
    out2 = jax.block_until_ready(proportional_signed_mse(p2, t2))
    ref2 = _reference(p2, t2)
    assert jnp.allclose(out2, ref2, rtol=1e-4, atol=1e-5), (out2, ref2)

    print("KERNEL_OK")
</pallas_src>

<mosaic_0001>
module attributes {stable_mosaic.version = 11 : i64} {
  func.func @_psmse_kernel(%arg0: i32, %arg1: i32, %arg2: memref<16x128xf32, #tpu.memory_space<vmem>>, %arg3: memref<16x128xf32, #tpu.memory_space<vmem>>, %arg4: memref<1x8x128xf32, #tpu.memory_space<vmem>>) attributes {dimension_semantics = [#tpu.dimension_semantics<parallel>, #tpu.dimension_semantics<arbitrary>], iteration_bounds = array<i64: 1, 1>, scalar_prefetch = 0 : i64, scratch_operands = 0 : i64, tpu.core_type = #tpu.core_type<tc>, window_params = [{transform_indices = @transform_0, window_bounds = array<i64: 16, 128>}, {transform_indices = @transform_1, window_bounds = array<i64: 16, 128>}, {transform_indices = @transform_2, window_bounds = array<i64: 1, 8, 128>}]} {
    %c0_i32 = arith.constant 0 : i32
    %0 = arith.cmpi eq, %arg1, %c0_i32 : i32
    %1 = arith.extui %0 : i1 to i32
    %c0_i32_0 = arith.constant 0 : i32
    %2 = arith.cmpi ne, %1, %c0_i32_0 : i32
    scf.if %2 {
      %cst_12 = arith.constant 0.000000e+00 : f32
      %32 = vector.broadcast %cst_12 : f32 to vector<1x8x128xf32>
      %c0_13 = arith.constant 0 : index
      %c0_14 = arith.constant 0 : index
      %c0_15 = arith.constant 0 : index
      %33 = vector.load %arg4[%c0_13, %c0_14, %c0_15] : memref<1x8x128xf32, #tpu.memory_space<vmem>>, vector<1x8x128xf32>
      tpu.vector_store %arg4[%c0_13, %c0_14, %c0_15], %32 {strides = array<i32>} : memref<1x8x128xf32, #tpu.memory_space<vmem>>, vector<1x8x128xf32>,
    } else {
    }
    %c1_i32 = arith.constant 1 : i32
    %3 = arith.muli %arg0, %c1_i32 : i32
    %4 = arith.addi %3, %arg1 : i32
    %c16_i32 = arith.constant 16 : i32
    %5 = arith.muli %4, %c16_i32 : i32
    %c16_i32_1 = arith.constant 16 : i32
    %6 = arith.subi %c16_i32_1, %5 : i32
    %c0 = arith.constant 0 : index
    %c0_2 = arith.constant 0 : index
    %7 = vector.load %arg2[%c0, %c0_2] : memref<16x128xf32, #tpu.memory_space<vmem>>, vector<16x128xf32>
    %c0_3 = arith.constant 0 : index
    %c0_4 = arith.constant 0 : index
    %8 = vector.load %arg3[%c0_3, %c0_4] : memref<16x128xf32, #tpu.memory_space<vmem>>, vector<16x128xf32>
    %9 = arith.subf %7, %8 : vector<16x128xf32>
    %10 = arith.mulf %9, %9 : vector<16x128xf32>
    %11 = math.absf %8 : vector<16x128xf32>
    %cst = arith.constant 0.00999999977 : f32
    %12 = vector.broadcast %cst : f32 to vector<16x128xf32>
    %13 = arith.addf %11, %12 : vector<16x128xf32>
    %14 = tpu.reciprocal %13 : vector<16x128xf32> -> vector<16x128xf32>
    %15 = arith.mulf %8, %7 : vector<16x128xf32>
    %cst_5 = arith.constant 0.000000e+00 : f32
    %16 = vector.broadcast %cst_5 : f32 to vector<16x128xf32>
    %17 = arith.cmpf ogt, %15, %16 : vector<16x128xf32>
    %18 = arith.mulf %8, %8 : vector<16x128xf32>
    %19 = arith.subf %10, %18 : vector<16x128xf32>
    %cst_6 = arith.constant 1.000000e+00 : f32
    %20 = vector.broadcast %cst_6 : f32 to vector<16x128xf32>
    %21 = arith.mulf %20, %19 : vector<16x128xf32>
    %cst_7 = arith.constant 0.000000e+00 : f32
    %22 = vector.broadcast %cst_7 : f32 to vector<16x128xf32>
    %23 = arith.select %17, %22, %21 : vector<16x128xi1>, vector<16x128xf32>
    %24 = arith.addf %10, %23 : vector<16x128xf32>
    %25 = arith.mulf %24, %14 : vector<16x128xf32>
    %c16_i32_8 = arith.constant 16 : i32
    %26 = arith.cmpi sge, %6, %c16_i32_8 : i32
    %27 = arith.extui %26 : i1 to i32
    %c0_i32_9 = arith.constant 0 : i32
    %28 = arith.cmpi ne, %27, %c0_i32_9 : i32
    scf.if %28 {
      %c0_12 = arith.constant 0 : index
      %c0_13 = arith.constant 0 : index
      %c0_14 = arith.constant 0 : index
      %32 = vector.load %arg4[%c0_12, %c0_13, %c0_14] : memref<1x8x128xf32, #tpu.memory_space<vmem>>, vector<1x8x128xf32>
      %33 = vector.shape_cast %25 : vector<16x128xf32> to vector<2x8x128xf32>
      %cst_15 = arith.constant dense<0.000000e+00> : vector<8x128xf32>
      %34 = vector.multi_reduction <add>, %33, %cst_15 [0] : vector<2x8x128xf32> to vector<8x128xf32>
      %35 = vector.shape_cast %34 : vector<8x128xf32> to vector<1x8x128xf32>
      %36 = arith.addf %32, %35 : vector<1x8x128xf32>
      %c0_16 = arith.constant 0 : index
      %c0_17 = arith.constant 0 : index
      %c0_18 = arith.constant 0 : index
      %37 = vector.load %arg4[%c0_16, %c0_17, %c0_18] : memref<1x8x128xf32, #tpu.memory_space<vmem>>, vector<1x8x128xf32>
      tpu.vector_store %arg4[%c0_16, %c0_17, %c0_18], %36 {strides = array<i32>} : memref<1x8x128xf32, #tpu.memory_space<vmem>>, vector<1x8x128xf32>,
    } else {
    }
    %c16_i32_10 = arith.constant 16 : i32
    %29 = arith.cmpi slt, %6, %c16_i32_10 : i32
    %30 = arith.extui %29 : i1 to i32
    %c0_i32_11 = arith.constant 0 : i32
    %31 = arith.cmpi ne, %30, %c0_i32_11 : i32
    scf.if %31 {
      %32 = tpu.iota {dimensions = array<i32: 0>} : vector<16x128xi32>
      %33 = vector.broadcast %6 : i32 to vector<16x128xi32>
      %34 = arith.cmpi slt, %32, %33 : vector<16x128xi32>
      %cst_12 = arith.constant 0.000000e+00 : f32
      %35 = vector.broadcast %cst_12 : f32 to vector<16x128xf32>
      %36 = arith.select %34, %25, %35 : vector<16x128xi1>, vector<16x128xf32>
      %c0_13 = arith.constant 0 : index
      %c0_14 = arith.constant 0 : index
      %c0_15 = arith.constant 0 : index
      %37 = vector.load %arg4[%c0_13, %c0_14, %c0_15] : memref<1x8x128xf32, #tpu.memory_space<vmem>>, vector<1x8x128xf32>
      %38 = vector.shape_cast %36 : vector<16x128xf32> to vector<2x8x128xf32>
      %cst_16 = arith.constant dense<0.000000e+00> : vector<8x128xf32>
      %39 = vector.multi_reduction <add>, %38, %cst_16 [0] : vector<2x8x128xf32> to vector<8x128xf32>
      %40 = vector.shape_cast %39 : vector<8x128xf32> to vector<1x8x128xf32>
      %41 = arith.addf %37, %40 : vector<1x8x128xf32>
      %c0_17 = arith.constant 0 : index
      %c0_18 = arith.constant 0 : index
      %c0_19 = arith.constant 0 : index
      %42 = vector.load %arg4[%c0_17, %c0_18, %c0_19] : memref<1x8x128xf32, #tpu.memory_space<vmem>>, vector<1x8x128xf32>
      tpu.vector_store %arg4[%c0_17, %c0_18, %c0_19], %41 {strides = array<i32>} : memref<1x8x128xf32, #tpu.memory_space<vmem>>, vector<1x8x128xf32>,
    } else {
    }
    return
  }
  func.func @transform_0(%arg0: i32, %arg1: i32) -> (i32, i32) {
    %c1_i32 = arith.constant 1 : i32
    %0 = arith.muli %arg0, %c1_i32 : i32
    %1 = arith.addi %0, %arg1 : i32
    %c0_i32 = arith.constant 0 : i32
    %2 = arith.minsi %1, %c0_i32 : i32
    %c0_i32_0 = arith.constant 0 : i32
    %c0_i32_1 = arith.constant 0 : i32
    return %2, %c0_i32_0 : i32, i32
  }
  func.func @transform_1(%arg0: i32, %arg1: i32) -> (i32, i32) {
    %c1_i32 = arith.constant 1 : i32
    %0 = arith.muli %arg0, %c1_i32 : i32
    %1 = arith.addi %0, %arg1 : i32
    %c0_i32 = arith.constant 0 : i32
    %2 = arith.minsi %1, %c0_i32 : i32
    %c0_i32_0 = arith.constant 0 : i32
    %c0_i32_1 = arith.constant 0 : i32
    return %2, %c0_i32_0 : i32, i32
  }
  func.func @transform_2(%arg0: i32, %arg1: i32) -> (i32, i32, i32) {
    %c0_i32 = arith.constant 0 : i32
    %c0_i32_0 = arith.constant 0 : i32
    %c0_i32_1 = arith.constant 0 : i32
    return %arg0, %c0_i32, %c0_i32_0 : i32, i32, i32
  }
}

</mosaic_0001>

<bundles_post_ra>
// kernel: tpu_custom_call.1
= control target key start
LH: loop header
LB: loop body
LE: loop exit
PB: predicated region body
PF: predicated region fallthrough
CT: control target
= control target key end

     0   :  { %7 = vsyncpa [#allocation3], 0  ;;  %s278_s0 = inlined_call_operand.hbm [shape: f32[16,128], index: 0, kind: input, shape index: {}]   ;;  %s279_s1 = inlined_call_operand.hbm [shape: f32[16,128], index: 1, kind: input, shape index: {}]   ;;  %s280_s2 = inlined_call_operand.hbm [shape: f32[1,8,128], index: 2, kind: output, shape index: {}]  }
   0x1   :  { %8 = vsyncpa [#allocation6], 0 }
   0x2   :  { %9 = vsyncpa [#allocation4], 0  ;;  %s222_s9 = smov [#allocation2]   ;;  %s150_s13 = scalar_lea.hbm %s278_s0, 256 }
   0x3   :  { %s21_s10 = sshll.u32 %s222_s9, 4  ;;  %p151_p0 = scmp.ne.s32.totalorder %s278_s0, %s150_s13  ;;  %s22_s10 = int_to_ptr.vmem [resolvable:$true] %s21_s10 }
   0x4   :  { %p154_p1 = scmp.lt.u32.totalorder %s150_s13, %s278_s0 }
   0x6   :  { %p156_p2 = pnand %p154_p1, %p151_p0 }
   0x8   :  { %159 = shalt.err (!%p156_p2)
}
   0x9   :  { %s160_s18 = scalar_lea.vmem %s22_s10, 256  ;;  %p165_p4 = scmp.lt.s32.totalorder %s22_s10, %s22_s10 }
   0xa   :  { %p161_p3 = scmp.ne.s32.totalorder %s22_s10, %s160_s18  ;;  %p166_p5 = scmp.lt.s32.totalorder %s160_s18, %s160_s18 }
   0xc   :  { %p167_p6 = por %p166_p5, %p165_p4 }
   0xe   :  { %p168_p7 = pnand %p167_p6, %p161_p3 }
  0x10   :  { %171 = shalt.err (!%p168_p7)
}
  0x11   :  { %s223_s19 = smov 128   ;;  %s224_s20 = smov 8  }
  0x12   :  { %27 = dma.hbm_to_vmem [thread:$0]  %s278_s0, 256, %s22_s10, [#allocation3], %s223_s19, %s223_s19, %s224_s20  }
  0x13   :  { %s225_s23 = smov [#allocation5]   ;;  %s172_s27 = scalar_lea.hbm %s279_s1, 256 }
  0x14   :  { %s39_s24 = sshll.u32 %s225_s23, 4  ;;  %p173_p8 = scmp.ne.s32.totalorder %s279_s1, %s172_s27  ;;  %s40_s24 = int_to_ptr.vmem [resolvable:$true] %s39_s24 }
  0x15   :  { %p176_p9 = scmp.lt.u32.totalorder %s172_s27, %s279_s1 }
  0x17   :  { %p178_p10 = pnand %p176_p9, %p173_p8 }
  0x19   :  { %181 = shalt.err (!%p178_p10)
}
  0x1a   :  { %s182_s4 = scalar_lea.vmem %s40_s24, 256  ;;  %p187_p12 = scmp.lt.s32.totalorder %s40_s24, %s40_s24 }
  0x1b   :  { %p183_p11 = scmp.ne.s32.totalorder %s40_s24, %s182_s4  ;;  %p188_p13 = scmp.lt.s32.totalorder %s182_s4, %s182_s4 }
  0x1d   :  { %p189_p0 = por %p188_p13, %p187_p12 }
  0x1f   :  { %p190_p1 = pnand %p189_p0, %p183_p11 }
  0x21   :  { %193 = shalt.err (!%p190_p1)
}
  0x22   :  { %45 = dma.hbm_to_vmem [thread:$0]  %s279_s1, 256, %s40_s24, [#allocation6], %s223_s19, %s223_s19, %s224_s20  }
  0x23   :  { %216 = dma.done.wait [#allocation3], 256  }
  0x24   :  { %217 = vsyncadd [#allocation3], 4294967040 }
  0x25   :  { %218 = dma.done.wait [#allocation6], 256  }
  0x26   :  { %219 = vsyncadd [#allocation6], 4294967040  ;;  %v68_v0 = vld [vmem:[#allocation2] sm:$0xff]  ;;  %v69_v1 = vld [vmem:[#allocation2 + $0x8] sm:$0xff]  ;;  %s226_s1 = smov [#allocation7]  }
  0x27   :  { %v70_v2 = vld [vmem:[#allocation5] sm:$0xff]  ;;  %v71_v3 = vld [vmem:[#allocation5 + $0x8] sm:$0xff]  ;;  %s126_s6 = sshll.u32 %s226_s1, 4  ;;  %s127_s6 = int_to_ptr.vmem [resolvable:$true] %s126_s6 }
  0x28   :  { %v72_v4 = vsub.f32 %v68_v0, %v70_v2  ;;  %v76_v5 = vand.u32 2147483647, %v70_v2  ;;  %v86_v6 = vmul.f32 %v70_v2, %v70_v2  ;;  %v73_v7 = vsub.f32 %v69_v1, %v71_v3  ;;  %s194_s7 = scalar_lea.vmem %s127_s6, 128  ;;  %p199_p3 = scmp.lt.s32.totalorder %s127_s6, %s127_s6 }
  0x29   :  { %v77_v8 = vand.u32 2147483647, %v71_v3  ;;  %v82_v9 = vmul.f32 %v70_v2, %v68_v0  ;;  %v87_v10 = vmul.f32 %v71_v3, %v71_v3  ;;  %v83_v13 = vmul.f32 %v71_v3, %v69_v1  ;;  %p195_p2 = scmp.ne.s32.totalorder %s127_s6, %s194_s7  ;;  %p200_p4 = scmp.lt.s32.totalorder %s194_s7, %s194_s7 }
  0x2a   :  { %v74_v11 = vmul.f32 %v72_v4, %v72_v4  ;;  %v78_v12 = vadd.f32 0.01, %v76_v5  ;;  %v75_v14 = vmul.f32 %v73_v7, %v73_v7 }
  0x2b   :  { %v79_v15 = vadd.f32 0.01, %v77_v8  ;;  %vm84_vm0 = vcmp.gt.f32.partialorder %v82_v9, 0.0  ;;  %vm85_vm1 = vcmp.gt.f32.partialorder %v83_v13, 0.0  ;;  %p201_p5 = por %p200_p4, %p199_p3 }
  0x2c   :  { %146 = vrcp.f32 %v78_v12  ;;  %v88_v16 = vsub.f32 %v74_v11, %v86_v6  ;;  %v89_v17 = vsub.f32 %v75_v14, %v87_v10 }
  0x2d   :  { %148 = vrcp.f32 %v79_v15  ;;  %p202_p6 = pnand %p201_p5, %p195_p2 }
  0x2e   :  { %v90_v18 = vsel %vm84_vm0, 0.0, %v88_v16  ;;  %v91_v19 = vsel %vm85_vm1, 0.0, %v89_v17 }
  0x2f   :  { %v92_v20 = vadd.f32 %v90_v18, %v74_v11  ;;  %v93_v21 = vadd.f32 %v91_v19, %v75_v14 }
  0x36   :  { %v147_v22 = vpop.eup %146 }
  0x37   :  { %v149_v23 = vpop.eup %148  ;;  %v94_v24 = vmul.f32 %v147_v22, %v92_v20 }
  0x38   :  { %v95_v25 = vmul.f32 %v149_v23, %v93_v21 }
  0x3a   :  { %v101_v26 = vadd.f32 %v95_v25, %v94_v24 }
  0x3c   :  { %103 = vst [vmem:[#allocation7] sm:$0xff] %v101_v26 }
  0x3d   :  { %205 = shalt.err (!%p202_p6)
}
  0x3e   :  { %s206_s10 = scalar_lea.hbm %s280_s2, 128 }
  0x3f   :  { %p207_p7 = scmp.ne.s32.totalorder %s280_s2, %s206_s10  ;;  %p210_p8 = scmp.lt.u32.totalorder %s206_s10, %s280_s2 }
  0x41   :  { %p212_p9 = pnand %p210_p8, %p207_p7 }
  0x43   :  { %215 = shalt.err (!%p212_p9)
}
  0x44   :  { %129 = dma.vmem_to_hbm [thread:$0]  %s127_s6, 128, %s280_s2, [#allocation4]  }
  0x45   :  { %220 = dma.done.wait [#allocation4], 128  }
  0x46   :  { %221 = vsyncadd [#allocation4], 4294967168 }
  0x47   :  { %133 = vsyncpa [#allocation3], 1 }
  0x48   :  { %134 = vsyncpa [#allocation6], 1 }
  0x49   :  { %135 = vsyncpa [#allocation4], 1 }

</bundles_post_ra>
